<compile_context>
chip_gen: v7x
topology: tpu7x:2x2x1
jax: 0.10.0
libtpu: 0.0.40
codegen_flags: <defaults>
</compile_context>

<pallas_src>
import functools

import numpy as np
import jax
import jax.numpy as jnp
from jax import lax
from jax.experimental import pallas as pl
from jax.experimental.pallas import tpu as pltpu

NUM_CLASSES = 10


def _single_buffer_weight_kwargs():
    """kwargs that make a grid-invariant weight BlockSpec single-buffered.

    pipeline_mode=pl.Buffered(1) halves the resident VMEM of constant weight
    blocks, but support for pipeline_mode on a top-level pallas_call varies
    across JAX builds.  Probe once with a tiny kernel; on any failure fall back
    to default (double) buffering, which is still correct.
    """
    if not hasattr(pl, "Buffered"):
        return {}
    try:
        def _probe_kernel(x_ref, w_ref, o_ref):
            o_ref[...] = x_ref[...] + w_ref[0]

        fn = pl.pallas_call(
            _probe_kernel,
            out_shape=jax.ShapeDtypeStruct((16, 128), jnp.float32),
            grid=(2,),
            in_specs=[
                pl.BlockSpec((8, 128), lambda i: (i, 0)),
                pl.BlockSpec((1, 8, 128), lambda i: (0, 0, 0),
                             pipeline_mode=pl.Buffered(1)),
            ],
            out_specs=pl.BlockSpec((8, 128), lambda i: (i, 0)),
        )
        jax.jit(fn).lower(jnp.zeros((16, 128), jnp.float32),
                          jnp.zeros((1, 8, 128), jnp.float32)).compile()
        return {"pipeline_mode": pl.Buffered(1)}
    except Exception:  # noqa: BLE001 -- unsupported build: default buffering
        return {}


_WEIGHT_SPEC_KW = _single_buffer_weight_kwargs()


def hesm_kernel(cols_ref, wconv_ref, bconv_ref, w1_ref, b1_ref, w2_ref, b2_ref,
                out_ref):
    # cols_ref : (27, BT*256) bf16  pooled im2col patches (sample-major, pixel-minor cols)
    # wconv_ref: (C, 27)      bf16  conv weight, (dy,dx,cin)-minor
    # bconv_ref: (C, 1)       f32
    # w1_ref   : (C, 256, F)  bf16  fc1 weight regrouped per conv channel
    # b1_ref   : (1, F)       f32
    # w2_ref   : (F, 10)      bf16
    # b2_ref   : (1, 10)      f32
    # out_ref  : (BT, 10)     f32
    n_ch, pn, _ = w1_ref.shape
    bt = out_ref.shape[0]

    # conv3x3 on the pooled patches: one (C,27)x(27, BT*256) MXU matmul, f32 acc.
    conv = jnp.dot(wconv_ref[...], cols_ref[...],
                   preferred_element_type=jnp.float32)            # (C, BT*256)
    conv = conv + bconv_ref[...]                                  # + bias
    sq = conv * conv                                              # x = x*x (f32 VPU)

    # fc1: cast to bf16 BEFORE the relayout reshape (halves the vld/vst bytes),
    # then one channel-batched MXU matmul plus a cheap channel reduction.
    sq3 = sq.astype(jnp.bfloat16).reshape(n_ch, bt, pn)           # (C, BT, 256)
    part = lax.dot_general(
        sq3, w1_ref[...],
        dimension_numbers=(((2,), (1,)), ((0,), (0,))),
        preferred_element_type=jnp.float32)                       # (C, BT, F)
    h1 = jnp.sum(part, axis=0) + b1_ref[...]                      # (BT, F) f32

    # fc2 (bf16 operands, f32 acc) + HE polynomial softmax: (1 + z + 0.5 z^2)/sum.
    logit = jnp.dot(h1.astype(jnp.bfloat16), w2_ref[...],
                    preferred_element_type=jnp.float32) + b2_ref[...]   # (BT, 10)
    out = 1.0 + logit + 0.5 * logit * logit
    denom = jnp.sum(out, axis=1, keepdims=True)
    out_ref[...] = (out * pl.reciprocal(denom, approx=True)).astype(out_ref.dtype)


@functools.partial(jax.jit,
                   static_argnames=("hidden_conv", "hidden_fc", "num_classes",
                                    "batch_tile", "vmem_limit_mb"))
def cifar_hesm_forward(x, params, *, hidden_conv, hidden_fc,
                       num_classes=NUM_CLASSES, batch_tile=256, vmem_limit_mb=48):
    # layout: x is NCHW (PyTorch convention), float32.
    B, Cin, H, W = x.shape
    KH = KW = 3
    Hp, Wp = H // 2, W // 2
    Pn = Hp * Wp
    NK = KH * KW * Cin
    assert Pn == 16 * 16, "module hard-codes a 16x16 post-pool grid"

    w_conv, b_conv, w1, b1, w2, b2 = (params[k] for k in
                                      ("w_conv", "b_conv", "w1", "b1", "w2", "b2"))

    # --- glue: im2col (zero pad 1) with the 2x2 avg-pool applied per shifted
    # slice, so the full-resolution (B, 27, 32, 32) patch tensor never exists.
    x_pad = jnp.pad(x, ((0, 0), (0, 0), (1, 1), (1, 1)))
    pooled = []
    for dy in range(KH):
        for dx in range(KW):
            s = x_pad[:, :, dy:dy + H, dx:dx + W]                 # (B, Cin, 32, 32)
            pooled.append(s.reshape(B, Cin, Hp, 2, Wp, 2).mean(axis=(3, 5)))
    cols = jnp.stack(pooled, axis=1).reshape(B, NK, Pn)  # k = (dy*3+dx)*Cin + cin

    # --- batch tiling (pad B up to a multiple of the tile) ---
    bt = min(batch_tile, B)
    # v7x megacore: if the whole batch fits one tile but is large enough that
    # halving it still keeps >=128 MXU rows per tile, split into two tiles so
    # both TensorCores get work on the 'parallel' grid axis.
    if bt == B and B >= 256:
        bt = ((B + 1) // 2 + 7) // 8 * 8
    Bp = ((B + bt - 1) // bt) * bt

    cols = cols.astype(jnp.bfloat16)           # cast BEFORE the pad / transpose
    if Bp != B:
        cols = jnp.pad(cols, ((0, Bp - B), (0, 0), (0, 0)))
    # (27, Bp*256) with columns sample-major / pixel-minor, bf16 for the MXU.
    cols2d = jnp.transpose(cols, (1, 0, 2)).reshape(NK, Bp * Pn)

    # --- glue: parameter re-layouts (pure permutations / casts, no math) ---
    wconv_t = jnp.transpose(w_conv, (0, 2, 3, 1)).reshape(hidden_conv, NK)
    wconv_t = wconv_t.astype(jnp.bfloat16)
    bconv_c = b_conv.reshape(hidden_conv, 1).astype(jnp.float32)
    # torch flatten order after pool is (c, h, w): regroup fc1 weight per channel.
    w1_r = jnp.transpose(w1.reshape(hidden_fc, hidden_conv, Pn),
                         (1, 2, 0)).astype(jnp.bfloat16)          # (C, 256, F)
    b1_r = b1.reshape(1, hidden_fc).astype(jnp.float32)
    w2_t = jnp.transpose(w2).astype(jnp.bfloat16)                 # (F, 10)
    b2_r = b2.reshape(1, num_classes).astype(jnp.float32)

    grid = (Bp // bt,)
    out = pl.pallas_call(
        hesm_kernel,
        out_shape=jax.ShapeDtypeStruct((Bp, num_classes), jnp.float32),
        grid=grid,
        in_specs=[
            pl.BlockSpec((NK, bt * Pn), lambda i: (0, i)),               # streamed
            pl.BlockSpec((hidden_conv, NK), lambda i: (0, 0), **_WEIGHT_SPEC_KW),
            pl.BlockSpec((hidden_conv, 1), lambda i: (0, 0), **_WEIGHT_SPEC_KW),
            pl.BlockSpec((hidden_conv, Pn, hidden_fc), lambda i: (0, 0, 0),
                         **_WEIGHT_SPEC_KW),
            pl.BlockSpec((1, hidden_fc), lambda i: (0, 0), **_WEIGHT_SPEC_KW),
            pl.BlockSpec((hidden_fc, num_classes), lambda i: (0, 0),
                         **_WEIGHT_SPEC_KW),
            pl.BlockSpec((1, num_classes), lambda i: (0, 0), **_WEIGHT_SPEC_KW),
        ],
        out_specs=pl.BlockSpec((bt, num_classes), lambda i: (i, 0)),
        compiler_params=pltpu.CompilerParams(
            dimension_semantics=("parallel",),      # v7x: batch tiles across TCs
            vmem_limit_bytes=vmem_limit_mb * 1024 * 1024),
    )(cols2d, wconv_t, bconv_c, w1_r, b1_r, w2_t, b2_r)
    return out[:B]


def reference_forward(x, params, *, hidden_conv, hidden_fc):
    """Pure-JAX (f32) replica of the PyTorch forward, for verification."""
    w_conv, b_conv, w1, b1, w2, b2 = (params[k] for k in
                                      ("w_conv", "b_conv", "w1", "b1", "w2", "b2"))
    y = jax.lax.conv_general_dilated(
        x, w_conv, window_strides=(1, 1), padding=((1, 1), (1, 1)),
        dimension_numbers=("NCHW", "OIHW", "NCHW"))
    y = y + b_conv[None, :, None, None]
    B, C, H, W = y.shape
    y = y.reshape(B, C, H // 2, 2, W // 2, 2).mean(axis=(3, 5))   # AvgPool2d(2)
    y = y * y
    flat = y.reshape(B, hidden_conv * 16 * 16)
    h1 = flat @ w1.T + b1
    logit = h1 @ w2.T + b2
    out = 1.0 + logit + 0.5 * logit ** 2
    return out / jnp.sum(out, axis=1, keepdims=True)


def init_params(key, hidden_conv, hidden_fc, num_classes=NUM_CLASSES, kernel_size=3):
    """Deterministic PyTorch-shaped parameters (uniform +-1/sqrt(fan_in))."""
    ks = jax.random.split(key, 6)
    cin = 3

    def u(k, shape, fan_in):
        b = 1.0 / np.sqrt(fan_in)
        return jax.random.uniform(k, shape, jnp.float32, -b, b)

    return {
        "w_conv": u(ks[0], (hidden_conv, cin, kernel_size, kernel_size),
                    cin * kernel_size ** 2),
        "b_conv": u(ks[1], (hidden_conv,), cin * kernel_size ** 2),
        "w1": u(ks[2], (hidden_fc, hidden_conv * 16 * 16), hidden_conv * 16 * 16),
        "b1": u(ks[3], (hidden_fc,), hidden_conv * 16 * 16),
        "w2": u(ks[4], (num_classes, hidden_fc), hidden_fc),
        "b2": u(ks[5], (num_classes,), hidden_fc),
    }


if __name__ == "__main__":
    key = jax.random.PRNGKey(0)
    kx, kp = jax.random.split(key)
    # Small instantiation (module defaults are hidden_conv=32, hidden_fc=128);
    # spatial size must be 32x32 because the module hard-codes 16*16 post-pool.
    hidden_conv, hidden_fc = 8, 32
    x = jax.random.normal(kx, (2, 3, 32, 32), jnp.float32)
    params = init_params(kp, hidden_conv, hidden_fc)

    out = cifar_hesm_forward(x, params, hidden_conv=hidden_conv, hidden_fc=hidden_fc)
    out = jax.block_until_ready(out)

    ref = reference_forward(x, params, hidden_conv=hidden_conv, hidden_fc=hidden_fc)
    assert out.shape == (2, NUM_CLASSES)
    # bf16 MXU operands (f32 accumulation) -> slightly looser tolerance than pure f32.
    if not bool(jnp.allclose(out, ref, rtol=2e-2, atol=2e-3)):
        raise AssertionError(
            f"kernel/reference mismatch, max abs diff = {jnp.max(jnp.abs(out - ref))}")
    print("KERNEL_OK")
</pallas_src>

<mosaic_0001>
module attributes {stable_mosaic.version = 11 : i64} {
  func.func @hesm_kernel(%arg0: i32, %arg1: memref<27x512xbf16, #tpu.memory_space<vmem>>, %arg2: memref<8x27xbf16, #tpu.memory_space<vmem>>, %arg3: memref<8x1xf32, #tpu.memory_space<vmem>>, %arg4: memref<8x256x32xbf16, #tpu.memory_space<vmem>>, %arg5: memref<1x32xf32, #tpu.memory_space<vmem>>, %arg6: memref<32x10xbf16, #tpu.memory_space<vmem>>, %arg7: memref<1x10xf32, #tpu.memory_space<vmem>>, %arg8: memref<2x10xf32, #tpu.memory_space<vmem>>) attributes {dimension_semantics = [#tpu.dimension_semantics<parallel>], iteration_bounds = array<i64: 1>, scalar_prefetch = 0 : i64, scratch_operands = 0 : i64, tpu.core_type = #tpu.core_type<tc>, window_params = [{transform_indices = @transform_0, window_bounds = array<i64: 27, 512>}, {pipeline_mode = #tpu.pipeline_mode<synchronous>, transform_indices = @transform_1, window_bounds = array<i64: 8, 27>}, {pipeline_mode = #tpu.pipeline_mode<synchronous>, transform_indices = @transform_2, window_bounds = array<i64: 8, 1>}, {pipeline_mode = #tpu.pipeline_mode<synchronous>, transform_indices = @transform_3, window_bounds = array<i64: 8, 256, 32>}, {pipeline_mode = #tpu.pipeline_mode<synchronous>, transform_indices = @transform_4, window_bounds = array<i64: 1, 32>}, {pipeline_mode = #tpu.pipeline_mode<synchronous>, transform_indices = @transform_5, window_bounds = array<i64: 32, 10>}, {pipeline_mode = #tpu.pipeline_mode<synchronous>, transform_indices = @transform_6, window_bounds = array<i64: 1, 10>}, {transform_indices = @transform_7, window_bounds = array<i64: 2, 10>}]} {
    %c0 = arith.constant 0 : index
    %c0_0 = arith.constant 0 : index
    %0 = vector.load %arg2[%c0, %c0_0] : memref<8x27xbf16, #tpu.memory_space<vmem>>, vector<8x27xbf16>
    %c0_1 = arith.constant 0 : index
    %c0_2 = arith.constant 0 : index
    %1 = vector.load %arg1[%c0_1, %c0_2] : memref<27x512xbf16, #tpu.memory_space<vmem>>, vector<27x512xbf16>
    %cst = arith.constant dense<0.000000e+00> : vector<8x512xf32>
    %2 = tpu.matmul %0, %1, %cst {dimension_numbers = #tpu.dot_dimension_numbers<[1], [0], [0], [1], [0, 0, 1, 1], [], []>} : vector<8x27xbf16>, vector<27x512xbf16>, vector<8x512xf32> -> vector<8x512xf32>
    %c0_3 = arith.constant 0 : index
    %c0_4 = arith.constant 0 : index
    %3 = vector.load %arg3[%c0_3, %c0_4] : memref<8x1xf32, #tpu.memory_space<vmem>>, vector<8x1xf32>
    %4 = vector.broadcast %3 : vector<8x1xf32> to vector<8x512xf32>
    %5 = arith.addf %2, %4 : vector<8x512xf32>
    %6 = arith.mulf %5, %5 : vector<8x512xf32>
    %7 = arith.truncf %6 : vector<8x512xf32> to vector<8x512xbf16>
    %8 = vector.shape_cast %7 : vector<8x512xbf16> to vector<8x2x256xbf16>
    %c0_5 = arith.constant 0 : index
    %c0_6 = arith.constant 0 : index
    %c0_7 = arith.constant 0 : index
    %9 = vector.load %arg4[%c0_5, %c0_6, %c0_7] : memref<8x256x32xbf16, #tpu.memory_space<vmem>>, vector<8x256x32xbf16>
    %cst_8 = arith.constant dense<0.000000e+00> : vector<8x2x32xf32>
    %10 = tpu.matmul %8, %9, %cst_8 {dimension_numbers = #tpu.dot_dimension_numbers<[2], [1], [1], [2], [0, 0, 0, 1, 1, 2], [0], [0]>} : vector<8x2x256xbf16>, vector<8x256x32xbf16>, vector<8x2x32xf32> -> vector<8x2x32xf32>
    %cst_9 = arith.constant dense<0.000000e+00> : vector<2x32xf32>
    %11 = vector.multi_reduction <add>, %10, %cst_9 [0] : vector<8x2x32xf32> to vector<2x32xf32>
    %c0_10 = arith.constant 0 : index
    %c0_11 = arith.constant 0 : index
    %12 = vector.load %arg5[%c0_10, %c0_11] : memref<1x32xf32, #tpu.memory_space<vmem>>, vector<1x32xf32>
    %13 = vector.broadcast %12 : vector<1x32xf32> to vector<2x32xf32>
    %14 = arith.addf %11, %13 : vector<2x32xf32>
    %15 = arith.truncf %14 : vector<2x32xf32> to vector<2x32xbf16>
    %c0_12 = arith.constant 0 : index
    %c0_13 = arith.constant 0 : index
    %16 = vector.load %arg6[%c0_12, %c0_13] : memref<32x10xbf16, #tpu.memory_space<vmem>>, vector<32x10xbf16>
    %cst_14 = arith.constant dense<0.000000e+00> : vector<2x10xf32>
    %17 = tpu.matmul %15, %16, %cst_14 {dimension_numbers = #tpu.dot_dimension_numbers<[1], [0], [0], [1], [0, 0, 1, 1], [], []>} : vector<2x32xbf16>, vector<32x10xbf16>, vector<2x10xf32> -> vector<2x10xf32>
    %c0_15 = arith.constant 0 : index
    %c0_16 = arith.constant 0 : index
    %18 = vector.load %arg7[%c0_15, %c0_16] : memref<1x10xf32, #tpu.memory_space<vmem>>, vector<1x10xf32>
    %19 = vector.broadcast %18 : vector<1x10xf32> to vector<2x10xf32>
    %20 = arith.addf %17, %19 : vector<2x10xf32>
    %cst_17 = arith.constant 1.000000e+00 : f32
    %21 = vector.broadcast %cst_17 : f32 to vector<2x10xf32>
    %22 = arith.addf %21, %20 : vector<2x10xf32>
    %cst_18 = arith.constant 5.000000e-01 : f32
    %23 = vector.broadcast %cst_18 : f32 to vector<2x10xf32>
    %24 = arith.mulf %23, %20 : vector<2x10xf32>
    %25 = arith.mulf %24, %20 : vector<2x10xf32>
    %26 = arith.addf %22, %25 : vector<2x10xf32>
    %cst_19 = arith.constant dense<0.000000e+00> : vector<2xf32>
    %27 = vector.multi_reduction <add>, %26, %cst_19 [1] : vector<2x10xf32> to vector<2xf32>
    %28 = vector.shape_cast %27 : vector<2xf32> to vector<2x1xf32>
    %29 = tpu.reciprocal %28 {approx = true} : vector<2x1xf32> -> vector<2x1xf32>
    %30 = vector.broadcast %29 : vector<2x1xf32> to vector<2x10xf32>
    %31 = arith.mulf %26, %30 : vector<2x10xf32>
    %c0_20 = arith.constant 0 : index
    %c0_21 = arith.constant 0 : index
    %32 = vector.load %arg8[%c0_20, %c0_21] : memref<2x10xf32, #tpu.memory_space<vmem>>, vector<2x10xf32>
    tpu.vector_store %arg8[%c0_20, %c0_21], %31 {strides = array<i32>} : memref<2x10xf32, #tpu.memory_space<vmem>>, vector<2x10xf32>,
    return
  }
  func.func @transform_0(%arg0: i32) -> (i32, i32) {
    %c0_i32 = arith.constant 0 : i32
    %c0_i32_0 = arith.constant 0 : i32
    return %c0_i32, %arg0 : i32, i32
  }
  func.func @transform_1(%arg0: i32) -> (i32, i32) {
    %c0_i32 = arith.constant 0 : i32
    %c0_i32_0 = arith.constant 0 : i32
    %c0_i32_1 = arith.constant 0 : i32
    return %c0_i32, %c0_i32_0 : i32, i32
  }
  func.func @transform_2(%arg0: i32) -> (i32, i32) {
    %c0_i32 = arith.constant 0 : i32
    %c0_i32_0 = arith.constant 0 : i32
    %c0_i32_1 = arith.constant 0 : i32
    return %c0_i32, %c0_i32_0 : i32, i32
  }
  func.func @transform_3(%arg0: i32) -> (i32, i32, i32) {
    %c0_i32 = arith.constant 0 : i32
    %c0_i32_0 = arith.constant 0 : i32
    %c0_i32_1 = arith.constant 0 : i32
    %c0_i32_2 = arith.constant 0 : i32
    return %c0_i32, %c0_i32_0, %c0_i32_1 : i32, i32, i32
  }
  func.func @transform_4(%arg0: i32) -> (i32, i32) {
    %c0_i32 = arith.constant 0 : i32
    %c0_i32_0 = arith.constant 0 : i32
    %c0_i32_1 = arith.constant 0 : i32
    return %c0_i32, %c0_i32_0 : i32, i32
  }
  func.func @transform_5(%arg0: i32) -> (i32, i32) {
    %c0_i32 = arith.constant 0 : i32
    %c0_i32_0 = arith.constant 0 : i32
    %c0_i32_1 = arith.constant 0 : i32
    return %c0_i32, %c0_i32_0 : i32, i32
  }
  func.func @transform_6(%arg0: i32) -> (i32, i32) {
    %c0_i32 = arith.constant 0 : i32
    %c0_i32_0 = arith.constant 0 : i32
    %c0_i32_1 = arith.constant 0 : i32
    return %c0_i32, %c0_i32_0 : i32, i32
  }
  func.func @transform_7(%arg0: i32) -> (i32, i32) {
    %c0_i32 = arith.constant 0 : i32
    %c0_i32_0 = arith.constant 0 : i32
    return %arg0, %c0_i32 : i32, i32
  }
}

</mosaic_0001>

<bundles_post_ra>
// kernel: cifar_hesm_forward.1
= control target key start
LH: loop header
LB: loop body
LE: loop exit
PB: predicated region body
PF: predicated region fallthrough
CT: control target
= control target key end

     0   :  { %vm83_vm0 = vcmask 1044480   ;;  %vm84_vm1 = vcmask 1045504   ;;  %v2316_v4 = vmov 65535   ;;  %v2317_v6 = vmov 0   ;;  %s2898_s0 = inlined_call_operand.vmem [shape: bf16[27,512], index: 0, kind: input, shape index: {}]   ;;  %s2899_s1 = inlined_call_operand.vmem [shape: bf16[8,27], index: 1, kind: input, shape index: {}]   ;;  %s2900_s2 = inlined_call_operand.vmem [shape: f32[8,1], index: 2, kind: input, shape index: {}]   ;;  %s2901_s3 = inlined_call_operand.vmem [shape: bf16[8,256,32], index: 3, kind: input, shape index: {}]   ;;  %s2902_s4 = inlined_call_operand.vmem [shape: f32[1,32], index: 4, kind: input, shape index: {}]   ;;  %s2903_s5 = inlined_call_operand.vmem [shape: bf16[32,10], index: 5, kind: input, shape index: {}]   ;;  %s2904_s6 = inlined_call_operand.vmem [shape: f32[1,10], index: 6, kind: input, shape index: {}]   ;;  %s2905_s7 = inlined_call_operand.hbm [shape: f32[2,10], index: 7, kind: output, shape index: {}]  }
   0x1   :  { %v2148_v0 = vld [vmem:[%s2898_s0 + $0x4] ss:$16 sps:$4 sm:$0xff]   ;;  %v2150_v1 = vld [vmem:[%s2898_s0 + $0xc] ss:$16 sps:$4 sm:$0xff]   ;;  %v2152_v2 = vld [vmem:[%s2898_s0] ss:$16 sps:$4 sm:$0xff]   ;;  %131 = vmatprep.mubr.bf16.mxu0 %v2317_v6  ;;  %172 = vmatprep.mubr.bf16.mxu1 %v2317_v6 }
   0x2   :  { %99 = vmatprep.subr.bf16.mxu0 %v2148_v0  ;;  %v2153_v3 = vld [vmem:[%s2898_s0 + $0x8] ss:$16 sps:$4 sm:$0xff]   ;;  %v85_v5 = vsel %vm83_vm0, 4294967295, %v2316_v4  ;;  %140 = vmatprep.subr.bf16.mxu1 %v2150_v1  ;;  %v2154_v7 = vld [vmem:[%s2898_s0 + $0x24] ss:$16 sps:$4 sm:$0x3f]  }
   0x3   :  { %v86_v8 = vsel %vm84_vm1, %v85_v5, 0  ;;  %100 = vmatpush1.bf16.msra.mxu0 %v2152_v2  ;;  %141 = vmatpush1.bf16.msra.mxu1 %v2153_v3  ;;  %v2156_v9 = vld [vmem:[%s2898_s0 + $0x2c] ss:$16 sps:$4 sm:$0x3f]   ;;  %v37_v14 = vld [vmem:[%s2900_s2] sm:$0xff]  ;;  %vm79_vm2 = vcmask 220160  }
   0x4   :  { %v91_v10 = vand.u32 %v2154_v7, %v86_v8  ;;  %v2158_v11 = vld [vmem:[%s2898_s0 + $0x20] ss:$16 sps:$4 sm:$0x3f]   ;;  %v2159_v12 = vld [vmem:[%s2898_s0 + $0x28] ss:$16 sps:$4 sm:$0x3f]   ;;  %2147 = vset.pattern.permute.xlu0 %v2317_v6  ;;  %v97_v13 = vand.u32 %v2156_v9, %v86_v8 }
   0x5   :  { %v88_v15 = vand.u32 %v2158_v11, %v86_v8  ;;  %v94_v16 = vand.u32 %v2159_v12, %v86_v8  ;;  %v28_v17 = vld [vmem:[%s2899_s1] sm:$0xf]  ;;  %40 = vperm.xlu0 %2147, %v37_v14   ;;  %v2164_v22 = vld [vmem:[%s2901_s3 + $0x48] sm:$0xff]   ;;  %v2168_v26 = vld [vmem:[%s2901_s3 + $0x50] sm:$0xff]  }
   0x6   :  { %101 = vmatprep.subr.bf16.mxu0 %v91_v10  ;;  %v2160_v18 = vld [vmem:[%s2901_s3 + $0x40] sm:$0xff]   ;;  %142 = vmatprep.subr.bf16.mxu1 %v97_v13  ;;  %v2165_v23 = vld [vmem:[%s2901_s3 + $0x8] sm:$0xff]   ;;  %v2169_v27 = vld [vmem:[%s2901_s3 + $0x10] sm:$0xff]  }
   0x7   :  { %v2161_v19 = vld [vmem:[%s2901_s3] sm:$0xff]   ;;  %102 = vmatpush1.bf16.msra.mxu0 %v88_v15  ;;  %143 = vmatpush1.bf16.msra.mxu1 %v94_v16  ;;  %v2166_v24 = vld [vmem:[%s2901_s3 + $0xc8] sm:$0xff]   ;;  %v2170_v28 = vld [vmem:[%s2901_s3 + $0xd0] sm:$0xff]  }
   0x8   :  { %v2162_v20 = vld [vmem:[%s2901_s3 + $0xc0] sm:$0xff]   ;;  %1953 = vmatprep.subr.bf16.mxu0 %v2160_v18  ;;  %v2167_v25 = vld [vmem:[%s2901_s3 + $0x88] sm:$0xff]   ;;  %v2171_v29 = vld [vmem:[%s2901_s3 + $0x90] sm:$0xff]  }
   0x9   :  { %v2163_v21 = vld [vmem:[%s2901_s3 + $0x80] sm:$0xff]   ;;  %1975 = vmatprep.subr.bf16.mxu1 %v2162_v20  ;;  %v2172_v30 = vld [vmem:[%s2901_s3 + $0x58] sm:$0xff]   ;;  %v2180_v38 = vld [vmem:[%s2901_s3 + $0x68] sm:$0xff]  }
   0xa   :  { %1818 = vmatmul.mubr.msk.bf16.vlgmr.msra.gmra.mrb[0].mxu0 %vm79_vm2, %v28_v17  ;;  %1819 = vmatmul.mubr.msk.bf16.vlgmr.msra.gmra.mrb[0].mxu1 %vm79_vm2, %v28_v17  ;;  %v2173_v31 = vld [vmem:[%s2901_s3 + $0x18] sm:$0xff]   ;;  %v2176_v34 = vld [vmem:[%s2901_s3 + $0x60] sm:$0xff]   ;;  %v2181_v39 = vld [vmem:[%s2901_s3 + $0x28] sm:$0xff]  }
   0xb   :  { %1954 = vmatpush3.bf16.msra.mxu0 %v2161_v19  ;;  %1976 = vmatpush3.bf16.msra.mxu1 %v2163_v21  ;;  %v2174_v32 = vld [vmem:[%s2901_s3 + $0xd8] sm:$0xff]   ;;  %v2177_v35 = vld [vmem:[%s2901_s3 + $0x20] sm:$0xff]   ;;  %v2182_v40 = vld [vmem:[%s2901_s3 + $0xe8] sm:$0xff]  }
   0xc   :  { %1955 = vmatprep.subr.bf16.mxu0 %v2164_v22  ;;  %1977 = vmatprep.subr.bf16.mxu1 %v2166_v24  ;;  %v2175_v33 = vld [vmem:[%s2901_s3 + $0x98] sm:$0xff]   ;;  %v2178_v36 = vld [vmem:[%s2901_s3 + $0xe0] sm:$0xff]   ;;  %v2183_v41 = vld [vmem:[%s2901_s3 + $0xa8] sm:$0xff]  }
   0xd   :  { %v2179_v37 = vld [vmem:[%s2901_s3 + $0xa0] sm:$0xff]   ;;  %v2184_v42 = vld [vmem:[%s2901_s3 + $0x70] sm:$0xff]   ;;  %v2188_v46 = vld [vmem:[%s2901_s3 + $0x78] sm:$0xff]  }
   0xe   :  { %v2185_v43 = vld [vmem:[%s2901_s3 + $0x30] sm:$0xff]  }
   0xf   :  { %1956 = vmatpush3.bf16.msra.mxu0 %v2165_v23  ;;  %1978 = vmatpush3.bf16.msra.mxu1 %v2167_v25  ;;  %v2186_v44 = vld [vmem:[%s2901_s3 + $0xf0] sm:$0xff]  }
  0x10   :  { %1957 = vmatprep.subr.bf16.mxu0 %v2168_v26  ;;  %1979 = vmatprep.subr.bf16.mxu1 %v2170_v28  ;;  %v2187_v45 = vld [vmem:[%s2901_s3 + $0xb0] sm:$0xff]  }
  0x13   :  { %1958 = vmatpush3.bf16.msra.mxu0 %v2169_v27  ;;  %1980 = vmatpush3.bf16.msra.mxu1 %v2171_v29 }
  0x14   :  { %1959 = vmatprep.subr.bf16.mxu0 %v2172_v30  ;;  %1981 = vmatprep.subr.bf16.mxu1 %v2174_v32 }
  0x17   :  { %1960 = vmatpush3.bf16.msra.mxu0 %v2173_v31  ;;  %1982 = vmatpush3.bf16.msra.mxu1 %v2175_v33 }
  0x18   :  { %1961 = vmatprep.subr.bf16.mxu0 %v2176_v34  ;;  %1983 = vmatprep.subr.bf16.mxu1 %v2178_v36 }
  0x1b   :  { %1962 = vmatpush3.bf16.msra.mxu0 %v2177_v35  ;;  %1984 = vmatpush3.bf16.msra.mxu1 %v2179_v37 }
  0x1c   :  { %1963 = vmatprep.subr.bf16.mxu0 %v2180_v38  ;;  %1985 = vmatprep.subr.bf16.mxu1 %v2182_v40 }
  0x1f   :  { %1964 = vmatpush3.bf16.msra.mxu0 %v2181_v39  ;;  %1986 = vmatpush3.bf16.msra.mxu1 %v2183_v41 }
  0x20   :  { %1965 = vmatprep.subr.bf16.mxu0 %v2184_v42  ;;  %1987 = vmatprep.subr.bf16.mxu1 %v2186_v44 }
  0x23   :  { %1966 = vmatpush3.bf16.msra.mxu0 %v2185_v43 }
  0x24   :  { %12 = vsyncpa [#allocation3], 0  ;;  %1988 = vmatpush3.bf16.msra.mxu1 %v2187_v45  ;;  %v2189_v47 = vld [vmem:[%s2901_s3 + $0x38] sm:$0xff]   ;;  %1967 = vmatprep.subr.bf16.mxu0 %v2188_v46  ;;  %v2192_v50 = vld [vmem:[%s2901_s3 + $0x140] sm:$0xff]   ;;  %v2318_v52 = vmov 1983009808   ;;  %v189_v54 = vlaneseq }
  0x25   :  { %v2190_v48 = vld [vmem:[%s2901_s3 + $0xf8] sm:$0xff]   ;;  %v2194_v51 = vld [vmem:[%s2901_s3 + $0x1c0] sm:$0xff]   ;;  %v187_v53 = vunpack.c.l.s4 %v2318_v52  ;;  %v2319_v55 = vmov 1934713408   ;;  %v2196_v45 = vld [vmem:[%s2901_s3 + $0x148] sm:$0xff]   ;;  %vm2321_vm3 = vmmov 0  }
  0x26   :  { %v2191_v49 = vld [vmem:[%s2901_s3 + $0xb8] sm:$0xff]   ;;  %1989 = vmatprep.subr.bf16.mxu1 %v2190_v48  ;;  %v195_v56 = vunpack.c.l.s4 %v2319_v55  ;;  %v190_v59 = vshrl.u32 %v189_v54, 7  ;;  %v2193_v39 = vld [vmem:[%s2901_s3 + $0x100] sm:$0xff]   ;;  %vm1693_vm4 = vcmask 254976   ;;  %vm1741_vm5 = vcmask 261120  }
  0x27   :  { %1968 = vmatpush3.bf16.msra.mxu0 %v2189_v47  ;;  %v188_v58 = vunpack.c.0.s8 %v187_v53  ;;  %v2195_v53 = vld [vmem:[%s2901_s3 + $0x180] sm:$0xff]   ;;  %vm1789_vm6 = vcmask 74752  }
  0x28   :  { %1990 = vmatpush3.bf16.msra.mxu1 %v2191_v49  ;;  %1997 = vmatprep.subr.bf16.mxu0 %v2192_v50  ;;  %v196_v63 = vunpack.c.0.s8 %v195_v56  ;;  %v2197_v56 = vld [vmem:[%s2901_s3 + $0x108] sm:$0xff]  }
  0x29   :  { %2019 = vmatprep.subr.bf16.mxu1 %v2194_v51  ;;  %v191_v9 = vsub.s32 %v188_v58, %v190_v59 }
  0x2a   :  { %v199_v16 = vsub.s32 %v196_v63, %v190_v59 }
  0x84   :  { %v41_v57 = vpop.permute.xlu0 %40 }
  0xdd   :  { %v133_v60 = vpop.f32.mrb[0].mxu0  ;;  %v174_v61 = vpop.f32.mrb[0].mxu1 }
  0xde   :  { %v134_v62 = vadd.f32 %v133_v60, %v41_v57  ;;  %v175_v0 = vadd.f32 %v174_v61, %v41_v57  ;;  %v135_v1 = vpop.f32.mrb[1].mxu0  ;;  %v176_v2 = vpop.f32.mrb[1].mxu1  ;;  %v2198_v60 = vld [vmem:[%s2901_s3 + $0x1c8] sm:$0xff]   ;;  %v2200_v61 = vld [vmem:[%s2901_s3 + $0x150] sm:$0xff]  }
  0xdf   :  { %v136_v3 = vadd.f32 %v135_v1, %v41_v57  ;;  %v177_v4 = vadd.f32 %v176_v2, %v41_v57  ;;  %v137_v5 = vpop.f32.mrb[2].mxu0  ;;  %v178_v7 = vpop.f32.mrb[2].mxu1 }
  0xe0   :  { %v181_v8 = vmul.f32 %v134_v62, %v134_v62  ;;  %v183_v10 = vmul.f32 %v175_v0, %v175_v0  ;;  %v138_v11 = vpop.f32.mrb[3].mxu0  ;;  %v179_v12 = vpop.f32.mrb[3].mxu1  ;;  %v2199_v7 = vld [vmem:[%s2901_s3 + $0x188] sm:$0xff]  }
  0xe1   :  { %v182_v13 = vmul.f32 %v136_v3, %v136_v3  ;;  %v184_v14 = vmul.f32 %v177_v4, %v177_v4  ;;  %v2201_v12 = vld [vmem:[%s2901_s3 + $0x110] sm:$0xff]  }
  0xe2   :  { %v185_v15 = vpack.c.bf16 %v181_v8, %v181_v8  ;;  %v210_v17 = vpack.c.bf16 %v183_v10, %v183_v10 }
  0xe3   :  { %v235_v18 = vpack.c.bf16 %v182_v13, %v182_v13  ;;  %v260_v19 = vpack.c.bf16 %v184_v14, %v184_v14  ;;  %v2202_v13 = vld [vmem:[%s2901_s3 + $0x1d0] sm:$0xff]  }
  0xe4   :  { %v192_v20 = vrot.slane %v185_v15, %v191_v9  ;;  %v217_v21 = vrot.slane %v210_v17, %v191_v9  ;;  %v2204_v17 = vld [vmem:[%s2901_s3 + $0x158] sm:$0xff]  }
  0xe5   :  { %v242_v22 = vrot.slane %v235_v18, %v191_v9  ;;  %v267_v23 = vrot.slane %v260_v19, %v191_v9 }
  0xe6   :  { %v193_v24 = vcombine.high %v192_v20, %v2317_v6  ;;  %v200_v25 = vrot.slane %v192_v20, %v199_v16  ;;  %v218_v26 = vcombine.high %v217_v21, %v2317_v6  ;;  %v225_v27 = vrot.slane %v217_v21, %v199_v16 }
  0xe7   :  { %v243_v28 = vcombine.high %v242_v22, %v2317_v6  ;;  %v250_v29 = vrot.slane %v242_v22, %v199_v16  ;;  %v268_v30 = vcombine.high %v267_v23, %v2317_v6  ;;  %v275_v31 = vrot.slane %v267_v23, %v199_v16  ;;  %v2205_v22 = vld [vmem:[%s2901_s3 + $0x118] sm:$0xff]  }
  0xe8   :  { %v2502_v32 = vrot.slane %v193_v24, %v199_v16  ;;  %v2504_v33 = vrot.slane %v218_v26, %v199_v16  ;;  %v287_v34 = vpack.i.b16 %v225_v27, %v200_v25  ;;  %v289_v35 = vshrl.u32 %v200_v25, 16  ;;  %v2206_v23 = vld [vmem:[%s2901_s3 + $0x1d8] sm:$0xff]  }
  0xe9   :  { %v2506_v36 = vrot.slane %v243_v28, %v199_v16  ;;  %v2508_v37 = vrot.slane %v268_v30, %v199_v16  ;;  %v319_v38 = vpack.i.b16 %v275_v31, %v250_v29  ;;  %v321_v40 = vshrl.u32 %v250_v29, 16  ;;  %v2207_v26 = vld [vmem:[%s2901_s3 + $0x198] sm:$0xff]   ;;  %v2210_v28 = vld [vmem:[%s2901_s3 + $0x1e0] sm:$0xff]  }
  0xea   :  { %v322_v41 = vshrl.u32 %v275_v31, 16  ;;  %v258_v42 = vcombine.high %v250_v29, %v2317_v6  ;;  %v283_v43 = vcombine.high %v275_v31, %v2317_v6  ;;  %v290_v44 = vshrl.u32 %v225_v27, 16  ;;  %v2212_v29 = vld [vmem:[%s2901_s3 + $0x168] sm:$0xff]   ;;  %v2211_v30 = vld [vmem:[%s2901_s3 + $0x1a0] sm:$0xff]  }
  0xeb   :  { %733 = vmatprep.mubr.bf16.mxu0 %v319_v38  ;;  %v2519_v46 = vcombine.high %v200_v25, %v2317_v6  ;;  %v2522_v47 = vcombine.high %v225_v27, %v2317_v6  ;;  %v335_v48 = vpack.i.b16 %v2508_v37, %v2506_v36  ;;  %v337_v49 = vshrl.u32 %v2506_v36, 16  ;;  %v2208_v25 = vld [vmem:[%s2901_s3 + $0x160] sm:$0xff]   ;;  %v2213_v31 = vld [vmem:[%s2901_s3 + $0x128] sm:$0xff]  }
  0xec   :  { %734 = vmatmul.mubr.bf16.vlgmr.msra.gmra.mrb[4].mxu0 %v287_v34  ;;  %v323_v50 = vpack.i.b16 %v322_v41, %v321_v40  ;;  %v327_v51 = vpack.i.b16 %v283_v43, %v258_v42  ;;  %v291_v52 = vpack.i.b16 %v290_v44, %v289_v35  ;;  %v329_v54 = vshrl.u32 %v258_v42, 16  ;;  %v2209_v27 = vld [vmem:[%s2901_s3 + $0x120] sm:$0xff]   ;;  %v2214_v34 = vld [vmem:[%s2901_s3 + $0x1e8] sm:$0xff]   ;;  %v2216_v35 = vld [vmem:[%s2901_s3 + $0x170] sm:$0xff]  }
  0xed   :  { %1998 = vmatpush3.bf16.msra.mxu0 %v2193_v39  ;;  %v330_v55 = vshrl.u32 %v283_v43, 16  ;;  %v295_v57 = vpack.i.b16 %v2522_v47, %v2519_v46  ;;  %v297_v58 = vshrl.u32 %v2519_v46, 16  ;;  %v298_v59 = vshrl.u32 %v2522_v47, 16  ;;  %v2215_v38 = vld [vmem:[%s2901_s3 + $0x1a8] sm:$0xff]   ;;  %v2217_v39 = vld [vmem:[%s2901_s3 + $0x130] sm:$0xff]   ;;  %v2220_v41 = vld [vmem:[%s2901_s3 + $0x178] sm:$0xff]  }
  0xee   :  { %869 = vmatprep.mubr.bf16.mxu1 %v323_v50  ;;  %1005 = vmatprep.mubr.bf16.mxu0 %v327_v51  ;;  %v338_v62 = vshrl.u32 %v2508_v37, 16  ;;  %v303_v63 = vpack.i.b16 %v2504_v33, %v2502_v32  ;;  %v2548_v0 = vcombine.high %v2506_v36, %v2317_v6  ;;  %v2552_v1 = vcombine.high %v2508_v37, %v2317_v6  ;;  %v2218_v40 = vld [vmem:[%s2901_s3 + $0x1f0] sm:$0xff]   ;;  %v2221_v43 = vld [vmem:[%s2901_s3 + $0x138] sm:$0xff]   ;;  %v2225_v50 = vld [vmem:[%s2901_s3 + $0x200] sm:$0xff]  }
  0xef   :  { %870 = vmatmul.mubr.bf16.vlgmr.msra.gmra.mrb[4].mxu1 %v291_v52  ;;  %1999 = vmatprep.subr.bf16.mxu0 %v2196_v45  ;;  %v331_v2 = vpack.i.b16 %v330_v55, %v329_v54  ;;  %v2554_v3 = vpack.i.b16 %v298_v59, %v297_v58  ;;  %v305_v4 = vshrl.u32 %v2502_v32, 16  ;;  %v306_v5 = vshrl.u32 %v2504_v33, 16  ;;  %v2219_v42 = vld [vmem:[%s2901_s3 + $0x1b0] sm:$0xff]   ;;  %v2222_v44 = vld [vmem:[%s2901_s3 + $0x1f8] sm:$0xff]   ;;  %v2224_v45 = vld [vmem:[%s2901_s3 + $0x240] sm:$0xff]  }
  0xf0   :  { %2020 = vmatpush3.bf16.msra.mxu1 %v2195_v53  ;;  %v2561_v8 = vpack.i.b16 %v338_v62, %v337_v49  ;;  %v343_v9 = vpack.i.b16 %v2552_v1, %v2548_v0  ;;  %v345_v10 = vshrl.u32 %v2548_v0, 16  ;;  %v346_v11 = vshrl.u32 %v2552_v1, 16  ;;  %v2223_v49 = vld [vmem:[%s2901_s3 + $0x1b8] sm:$0xff]   ;;  %v2226_v51 = vld [vmem:[%s2901_s3 + $0x2c0] sm:$0xff]   ;;  %v2228_v52 = vld [vmem:[%s2901_s3 + $0x248] sm:$0xff]  }
  0xf1   :  { %1141 = vmatprep.mubr.bf16.mxu1 %v331_v2  ;;  %2000 = vmatpush3.bf16.msra.mxu0 %v2197_v56  ;;  %v2573_v14 = vpack.i.b16 %v306_v5, %v305_v4  ;;  %v2577_v15 = vcombine.high %v2502_v32, %v2317_v6  ;;  %v2581_v16 = vcombine.high %v2504_v33, %v2317_v6  ;;  %v2203_v6 = vld [vmem:[%s2901_s3 + $0x190] sm:$0xff]   ;;  %v2227_v53 = vld [vmem:[%s2901_s3 + $0x280] sm:$0xff]   ;;  %v2229_v54 = vld [vmem:[%s2901_s3 + $0x208] sm:$0xff]  }
  0xf2   :  { %2021 = vmatprep.subr.bf16.mxu1 %v2198_v60  ;;  %2001 = vmatprep.subr.bf16.mxu0 %v2200_v61  ;;  %v2586_v18 = vpack.i.b16 %v346_v11, %v345_v10  ;;  %v2230_v55 = vld [vmem:[%s2901_s3 + $0x2c8] sm:$0xff]   ;;  %v2232_v46 = vld [vmem:[%s2901_s3 + $0x250] sm:$0xff]   ;;  %v2238_v58 = vld [vmem:[%s2901_s3 + $0x2d8] sm:$0xff]  }
  0xf3   :  { %v311_v19 = vpack.i.b16 %v2581_v16, %v2577_v15  ;;  %v313_v20 = vshrl.u32 %v2577_v15, 16  ;;  %v314_v21 = vshrl.u32 %v2581_v16, 16  ;;  %v2231_v36 = vld [vmem:[%s2901_s3 + $0x288] sm:$0xff]   ;;  %v2233_v37 = vld [vmem:[%s2901_s3 + $0x210] sm:$0xff]   ;;  %v2240_v59 = vld [vmem:[%s2901_s3 + $0x260] sm:$0xff]  }
  0xf4   :  { %2022 = vmatpush3.bf16.msra.mxu1 %v2199_v7  ;;  %v2234_v47 = vld [vmem:[%s2901_s3 + $0x2d0] sm:$0xff]   ;;  %v2239_v60 = vld [vmem:[%s2901_s3 + $0x298] sm:$0xff]   ;;  %v2241_v61 = vld [vmem:[%s2901_s3 + $0x220] sm:$0xff]  }
  0xf5   :  { %2002 = vmatpush3.bf16.msra.mxu0 %v2201_v12  ;;  %2023 = vmatprep.subr.bf16.mxu1 %v2202_v13  ;;  %v2601_v24 = vpack.i.b16 %v314_v21, %v313_v20  ;;  %v2235_v56 = vld [vmem:[%s2901_s3 + $0x290] sm:$0xff]   ;;  %v2242_v62 = vld [vmem:[%s2901_s3 + $0x2e0] sm:$0xff]   ;;  %v2244_v2 = vld [vmem:[%s2901_s3 + $0x268] sm:$0xff]  }
  0xf6   :  { %2003 = vmatprep.subr.bf16.mxu0 %v2204_v17  ;;  %v2245_v4 = vld [vmem:[%s2901_s3 + $0x228] sm:$0xff]   ;;  %v2248_v7 = vld [vmem:[%s2901_s3 + $0x270] sm:$0xff]   ;;  %v2252_v12 = vld [vmem:[%s2901_s3 + $0x278] sm:$0xff]  }
  0xf7   :  { %v2246_v5 = vld [vmem:[%s2901_s3 + $0x2e8] sm:$0xff]   ;;  %v2249_v10 = vld [vmem:[%s2901_s3 + $0x230] sm:$0xff]   ;;  %v2253_v17 = vld [vmem:[%s2901_s3 + $0x238] sm:$0xff]  }
  0xf8   :  { %2024 = vmatpush3.bf16.msra.mxu1 %v2203_v6  ;;  %v2250_v11 = vld [vmem:[%s2901_s3 + $0x2f0] sm:$0xff]   ;;  %v2254_v20 = vld [vmem:[%s2901_s3 + $0x2f8] sm:$0xff]   ;;  %v2256_v21 = vld [vmem:[%s2901_s3 + $0x340] sm:$0xff]  }
  0xf9   :  { %2004 = vmatpush3.bf16.msra.mxu0 %v2205_v22  ;;  %2025 = vmatprep.subr.bf16.mxu1 %v2206_v23  ;;  %v2251_v13 = vld [vmem:[%s2901_s3 + $0x2b0] sm:$0xff]   ;;  %v2255_v6 = vld [vmem:[%s2901_s3 + $0x2b8] sm:$0xff]   ;;  %v2257_v22 = vld [vmem:[%s2901_s3 + $0x300] sm:$0xff]  }
  0xfa   :  { %2005 = vmatprep.subr.bf16.mxu0 %v2208_v25  ;;  %v2258_v23 = vld [vmem:[%s2901_s3 + $0x3c0] sm:$0xff]   ;;  %v2260_v25 = vld [vmem:[%s2901_s3 + $0x348] sm:$0xff]   ;;  %v2264_v32 = vld [vmem:[%s2901_s3 + $0x350] sm:$0xff]  }
  0xfb   :  { %v2263_v33 = vld [vmem:[%s2901_s3 + $0x388] sm:$0xff]   ;;  %v2266_v0 = vld [vmem:[%s2901_s3 + $0x3d0] sm:$0xff]   ;;  %v2268_v1 = vld [vmem:[%s2901_s3 + $0x358] sm:$0xff]  }
  0xfc   :  { %2026 = vmatpush3.bf16.msra.mxu1 %v2207_v26  ;;  %v2259_v26 = vld [vmem:[%s2901_s3 + $0x380] sm:$0xff]  }
  0xfd   :  { %2006 = vmatpush3.bf16.msra.mxu0 %v2209_v27  ;;  %2027 = vmatprep.subr.bf16.mxu1 %v2210_v28  ;;  %v2261_v27 = vld [vmem:[%s2901_s3 + $0x308] sm:$0xff]  }
  0xfe   :  { %2007 = vmatprep.subr.bf16.mxu0 %v2212_v29  ;;  %v2262_v28 = vld [vmem:[%s2901_s3 + $0x3c8] sm:$0xff]   ;;  %v2272_v29 = vld [vmem:[%s2901_s3 + $0x360] sm:$0xff]  }
 0x100   :  { %2028 = vmatpush3.bf16.msra.mxu1 %v2211_v30  ;;  %v2271_v30 = vld [vmem:[%s2901_s3 + $0x398] sm:$0xff]  }
 0x101   :  { %2008 = vmatpush3.bf16.msra.mxu0 %v2213_v31  ;;  %2029 = vmatprep.subr.bf16.mxu1 %v2214_v34  ;;  %v2273_v31 = vld [vmem:[%s2901_s3 + $0x320] sm:$0xff]  }
 0x102   :  { %2009 = vmatprep.subr.bf16.mxu0 %v2216_v35  ;;  %v2274_v34 = vld [vmem:[%s2901_s3 + $0x3e0] sm:$0xff]   ;;  %v2276_v35 = vld [vmem:[%s2901_s3 + $0x368] sm:$0xff]  }
 0x104   :  { %2030 = vmatpush3.bf16.msra.mxu1 %v2215_v38  ;;  %v2275_v38 = vld [vmem:[%s2901_s3 + $0x3a0] sm:$0xff]  }
 0x105   :  { %2010 = vmatpush3.bf16.msra.mxu0 %v2217_v39  ;;  %2031 = vmatprep.subr.bf16.mxu1 %v2218_v40  ;;  %v2277_v39 = vld [vmem:[%s2901_s3 + $0x328] sm:$0xff]  }
 0x106   :  { %2011 = vmatprep.subr.bf16.mxu0 %v2220_v41  ;;  %v2278_v40 = vld [vmem:[%s2901_s3 + $0x3e8] sm:$0xff]   ;;  %v2280_v41 = vld [vmem:[%s2901_s3 + $0x370] sm:$0xff]  }
 0x108   :  { %2032 = vmatpush3.bf16.msra.mxu1 %v2219_v42  ;;  %v2279_v42 = vld [vmem:[%s2901_s3 + $0x3a8] sm:$0xff]  }
 0x109   :  { %2012 = vmatpush3.bf16.msra.mxu0 %v2221_v43  ;;  %2033 = vmatprep.subr.bf16.mxu1 %v2222_v44  ;;  %v2281_v43 = vld [vmem:[%s2901_s3 + $0x330] sm:$0xff]  }
 0x10a   :  { %2041 = vmatprep.subr.bf16.mxu0 %v2224_v45  ;;  %v2282_v44 = vld [vmem:[%s2901_s3 + $0x3f0] sm:$0xff]   ;;  %v2284_v45 = vld [vmem:[%s2901_s3 + $0x378] sm:$0xff]  }
 0x10c   :  { %2034 = vmatpush3.bf16.msra.mxu1 %v2223_v49  ;;  %1006 = vmatmul.mubr.bf16.vlgmr.msra.gmra.mrb[8].mxu0 %v295_v57  ;;  %v2237_v57 = vld [vmem:[%s2901_s3 + $0x218] sm:$0xff]   ;;  %v2283_v49 = vld [vmem:[%s2901_s3 + $0x3b0] sm:$0xff]  }
 0x10d   :  { %2042 = vmatpush3.bf16.msra.mxu0 %v2225_v50  ;;  %1277 = vmatprep.mubr.bf16.mxu0 %v335_v48  ;;  %v2236_v48 = vld [vmem:[%s2901_s3 + $0x258] sm:$0xff]  }
 0x10e   :  { %2063 = vmatprep.subr.bf16.mxu1 %v2226_v51  ;;  %2043 = vmatprep.subr.bf16.mxu0 %v2228_v52  ;;  %v2285_v50 = vld [vmem:[%s2901_s3 + $0x338] sm:$0xff]  }
 0x10f   :  { %1142 = vmatmul.mubr.bf16.vlgmr.msra.gmra.mrb[8].mxu1 %v2554_v3  ;;  %v2243_v3 = vld [vmem:[%s2901_s3 + $0x2a0] sm:$0xff]   ;;  %v2286_v51 = vld [vmem:[%s2901_s3 + $0x3f8] sm:$0xff]  }
 0x110   :  { %2064 = vmatpush3.bf16.msra.mxu1 %v2227_v53  ;;  %1413 = vmatprep.mubr.bf16.mxu1 %v2561_v8  ;;  %v2247_v8 = vld [vmem:[%s2901_s3 + $0x2a8] sm:$0xff]   ;;  %v2287_v52 = vld [vmem:[%s2901_s3 + $0x3b8] sm:$0xff]   ;;  %v2288_v53 = vld [vmem:[%s2903_s5] sm:$0xff]  }
 0x111   :  { %2044 = vmatpush3.bf16.msra.mxu0 %v2229_v54  ;;  %2065 = vmatprep.subr.bf16.mxu1 %v2230_v55  ;;  %v2320_v54 = vmov 0.0   ;;  %v2289_v55 = vld [vmem:[%s2903_s5 + $0x8] sm:$0xff]  }
 0x112   :  { %2045 = vmatprep.subr.bf16.mxu0 %v2232_v46 }
 0x114   :  { %2066 = vmatpush3.bf16.msra.mxu1 %v2231_v36 }
 0x115   :  { %2046 = vmatpush3.bf16.msra.mxu0 %v2233_v37  ;;  %2067 = vmatprep.subr.bf16.mxu1 %v2234_v47 }
 0x116   :  { %2047 = vmatprep.subr.bf16.mxu0 %v2236_v48 }
 0x118   :  { %2068 = vmatpush3.bf16.msra.mxu1 %v2235_v56 }
 0x119   :  { %2048 = vmatpush3.bf16.msra.mxu0 %v2237_v57  ;;  %2069 = vmatprep.subr.bf16.mxu1 %v2238_v58 }
 0x11a   :  { %2049 = vmatprep.subr.bf16.mxu0 %v2240_v59 }
 0x11c   :  { %2070 = vmatpush3.bf16.msra.mxu1 %v2239_v60 }
 0x11d   :  { %2050 = vmatpush3.bf16.msra.mxu0 %v2241_v61  ;;  %2071 = vmatprep.subr.bf16.mxu1 %v2242_v62 }
 0x11e   :  { %2051 = vmatprep.subr.bf16.mxu0 %v2244_v2 }
 0x120   :  { %2072 = vmatpush3.bf16.msra.mxu1 %v2243_v3 }
 0x121   :  { %2052 = vmatpush3.bf16.msra.mxu0 %v2245_v4  ;;  %2073 = vmatprep.subr.bf16.mxu1 %v2246_v5 }
 0x122   :  { %2053 = vmatprep.subr.bf16.mxu0 %v2248_v7 }
 0x124   :  { %2074 = vmatpush3.bf16.msra.mxu1 %v2247_v8 }
 0x125   :  { %2054 = vmatpush3.bf16.msra.mxu0 %v2249_v10  ;;  %2075 = vmatprep.subr.bf16.mxu1 %v2250_v11 }
 0x126   :  { %2055 = vmatprep.subr.bf16.mxu0 %v2252_v12 }
 0x128   :  { %2076 = vmatpush3.bf16.msra.mxu1 %v2251_v13 }
 0x129   :  { %2056 = vmatpush3.bf16.msra.mxu0 %v2253_v17  ;;  %2077 = vmatprep.subr.bf16.mxu1 %v2254_v20 }
 0x12a   :  { %2085 = vmatprep.subr.bf16.mxu0 %v2256_v21 }
 0x12c   :  { %2078 = vmatpush3.bf16.msra.mxu1 %v2255_v6  ;;  %1278 = vmatmul.mubr.bf16.vlgmr.msra.gmra.mrb[12].mxu0 %v303_v63  ;;  %v2265_v63 = vld [vmem:[%s2901_s3 + $0x310] sm:$0xff]  }
 0x12d   :  { %2086 = vmatpush3.bf16.msra.mxu0 %v2257_v22  ;;  %1549 = vmatprep.mubr.bf16.mxu0 %v343_v9  ;;  %v2267_v9 = vld [vmem:[%s2901_s3 + $0x390] sm:$0xff]  }
 0x12e   :  { %2107 = vmatprep.subr.bf16.mxu1 %v2258_v23  ;;  %2087 = vmatprep.subr.bf16.mxu0 %v2260_v25 }
 0x12f   :  { %1414 = vmatmul.mubr.bf16.vlgmr.msra.gmra.mrb[12].mxu1 %v2573_v14  ;;  %v2269_v14 = vld [vmem:[%s2901_s3 + $0x318] sm:$0xff]  }
 0x130   :  { %2108 = vmatpush3.bf16.msra.mxu1 %v2259_v26  ;;  %1685 = vmatprep.mubr.bf16.mxu1 %v2586_v18  ;;  %v2270_v18 = vld [vmem:[%s2901_s3 + $0x3d8] sm:$0xff]  }
 0x131   :  { %2088 = vmatpush3.bf16.msra.mxu0 %v2261_v27  ;;  %2109 = vmatprep.subr.bf16.mxu1 %v2262_v28 }
 0x132   :  { %2089 = vmatprep.subr.bf16.mxu0 %v2264_v32 }
 0x134   :  { %2110 = vmatpush3.bf16.msra.mxu1 %v2263_v33 }
 0x135   :  { %2090 = vmatpush3.bf16.msra.mxu0 %v2265_v63  ;;  %2111 = vmatprep.subr.bf16.mxu1 %v2266_v0 }
 0x136   :  { %2091 = vmatprep.subr.bf16.mxu0 %v2268_v1 }
 0x138   :  { %2112 = vmatpush3.bf16.msra.mxu1 %v2267_v9 }
 0x139   :  { %2092 = vmatpush3.bf16.msra.mxu0 %v2269_v14  ;;  %2113 = vmatprep.subr.bf16.mxu1 %v2270_v18 }
 0x13a   :  { %2093 = vmatprep.subr.bf16.mxu0 %v2272_v29 }
 0x13c   :  { %2114 = vmatpush3.bf16.msra.mxu1 %v2271_v30 }
 0x13d   :  { %2094 = vmatpush3.bf16.msra.mxu0 %v2273_v31  ;;  %2115 = vmatprep.subr.bf16.mxu1 %v2274_v34 }
 0x13e   :  { %2095 = vmatprep.subr.bf16.mxu0 %v2276_v35 }
 0x140   :  { %2116 = vmatpush3.bf16.msra.mxu1 %v2275_v38 }
 0x141   :  { %2096 = vmatpush3.bf16.msra.mxu0 %v2277_v39  ;;  %2117 = vmatprep.subr.bf16.mxu1 %v2278_v40 }
 0x142   :  { %2097 = vmatprep.subr.bf16.mxu0 %v2280_v41 }
 0x144   :  { %2118 = vmatpush3.bf16.msra.mxu1 %v2279_v42 }
 0x145   :  { %2098 = vmatpush3.bf16.msra.mxu0 %v2281_v43  ;;  %2119 = vmatprep.subr.bf16.mxu1 %v2282_v44  ;;  %v1948_v43 = vld [vmem:[%s2902_s4] ss:$0 sm:$0xff]  ;;  %s2322_s4 = smov [#allocation2]  }
 0x146   :  { %2099 = vmatprep.subr.bf16.mxu0 %v2284_v45  ;;  %s1802_s0 = sshll.u32 %s2322_s4, 4  ;;  %s1803_s0 = int_to_ptr.vmem [resolvable:$true] %s1802_s0 }
 0x147   :  { %p2297_p1 = scmp.lt.s32.totalorder %s1803_s0, %s1803_s0 }
 0x148   :  { %2120 = vmatpush3.bf16.msra.mxu1 %v2283_v49 }
 0x149   :  { %2100 = vmatpush3.bf16.msra.mxu0 %v2285_v50  ;;  %2121 = vmatprep.subr.bf16.mxu1 %v2286_v51  ;;  %v1949_v50 = vld [vmem:[%s2904_s6] ss:$0 sm:$0xff]  ;;  %s2292_s6 = scalar_lea.vmem %s1803_s0, 32 }
 0x14a   :  { %2132 = vmatprep.subr.bf16.mxu0 %v2320_v54  ;;  %p2293_p0 = scmp.ne.s32.totalorder %s1803_s0, %s2292_s6  ;;  %p2298_p2 = scmp.lt.s32.totalorder %s2292_s6, %s2292_s6 }
 0x14c   :  { %2122 = vmatpush3.bf16.msra.mxu1 %v2287_v52  ;;  %1550 = vmatmul.mubr.bf16.vlgmr.msra.gmra.mrb[16].mxu0 %v311_v19  ;;  %p2299_p3 = por %p2298_p2, %p2297_p1 }
 0x14d   :  { %2133 = vmatpush3.bf16.msra.mxu0 %v2288_v53  ;;  %2136 = vmatprep.mubr.msk.bf16.mxu0 %vm2321_vm3, %v2320_v54 }
 0x14e   :  { %2134 = vmatprep.subr.bf16.mxu0 %v2320_v54  ;;  %p2300_p4 = pnand %p2299_p3, %p2293_p0 }
 0x14f   :  { %1686 = vmatmul.mubr.bf16.vlgmr.msra.gmra.mrb[16].mxu1 %v2601_v24 }
 0x151   :  { %2135 = vmatpush3.bf16.msra.mxu0 %v2289_v55 }
 0x1bf   :  { %v1969_v46 = vpop.f32.mrb[4].mxu0 }
 0x1c0   :  { %v1970_v15 = vpop.f32.mrb[5].mxu0 }
 0x1c1   :  { %v1971_v16 = vadd.f32 %v1970_v15, %v1969_v46  ;;  %v1972_v19 = vpop.f32.mrb[6].mxu0 }
 0x1c2   :  { %v1991_v24 = vpop.f32.mrb[4].mxu1  ;;  %v1973_v36 = vpop.f32.mrb[7].mxu0 }
 0x1c3   :  { %v1992_v37 = vpop.f32.mrb[5].mxu1  ;;  %v1694_v57 = vsel %vm1693_vm4, %v1971_v16, 0.0 }
 0x1c4   :  { %v1993_v47 = vadd.f32 %v1992_v37, %v1991_v24  ;;  %v1994_v48 = vpop.f32.mrb[6].mxu1 }
 0x1c5   :  { %v1995_v56 = vpop.f32.mrb[7].mxu1 }
 0x1c6   :  { %v1695_v58 = vsel %vm1693_vm4, %v1993_v47, 0.0 }
 0x1c7   :  { %v1696_v59 = vadd.f32 %v1695_v58, %v1694_v57 }
 0x1df   :  { %v2013_v60 = vpop.f32.mrb[8].mxu0 }
 0x1e0   :  { %v2014_v61 = vpop.f32.mrb[9].mxu0 }
 0x1e1   :  { %v2015_v62 = vadd.f32 %v2014_v61, %v2013_v60  ;;  %v2016_v2 = vpop.f32.mrb[10].mxu0 }
 0x1e2   :  { %v2035_v3 = vpop.f32.mrb[8].mxu1  ;;  %v2017_v4 = vpop.f32.mrb[11].mxu0 }
 0x1e3   :  { %v1697_v5 = vsel %vm1693_vm4, %v2015_v62, 0.0  ;;  %v2036_v7 = vpop.f32.mrb[9].mxu1 }
 0x1e4   :  { %v1698_v8 = vadd.f32 %v1697_v5, %v1696_v59  ;;  %v2037_v10 = vadd.f32 %v2036_v7, %v2035_v3  ;;  %v2038_v11 = vpop.f32.mrb[10].mxu1 }
 0x1e5   :  { %v2039_v12 = vpop.f32.mrb[11].mxu1 }
 0x1e6   :  { %v1699_v13 = vsel %vm1693_vm4, %v2037_v10, 0.0 }
 0x1e7   :  { %v1700_v17 = vadd.f32 %v1699_v13, %v1698_v8 }
 0x1ff   :  { %v2057_v20 = vpop.f32.mrb[12].mxu0 }
 0x200   :  { %v2058_v21 = vpop.f32.mrb[13].mxu0 }
 0x201   :  { %v2059_v6 = vadd.f32 %v2058_v21, %v2057_v20  ;;  %v2060_v22 = vpop.f32.mrb[14].mxu0 }
 0x202   :  { %v2079_v23 = vpop.f32.mrb[12].mxu1  ;;  %v2061_v25 = vpop.f32.mrb[15].mxu0 }
 0x203   :  { %v1701_v26 = vsel %vm1693_vm4, %v2059_v6, 0.0  ;;  %v2080_v27 = vpop.f32.mrb[13].mxu1 }
 0x204   :  { %v1702_v28 = vadd.f32 %v1701_v26, %v1700_v17  ;;  %v2081_v32 = vadd.f32 %v2080_v27, %v2079_v23  ;;  %v2082_v33 = vpop.f32.mrb[14].mxu1 }
 0x205   :  { %v2083_v63 = vpop.f32.mrb[15].mxu1 }
 0x206   :  { %v1703_v0 = vsel %vm1693_vm4, %v2081_v32, 0.0 }
 0x207   :  { %v1704_v1 = vadd.f32 %v1703_v0, %v1702_v28 }
 0x21f   :  { %v2101_v9 = vpop.f32.mrb[16].mxu0 }
 0x220   :  { %v2102_v14 = vpop.f32.mrb[17].mxu0 }
 0x221   :  { %v2103_v18 = vadd.f32 %v2102_v14, %v2101_v9  ;;  %v2104_v29 = vpop.f32.mrb[18].mxu0 }
 0x222   :  { %v2123_v30 = vpop.f32.mrb[16].mxu1  ;;  %v2105_v31 = vpop.f32.mrb[19].mxu0 }
 0x223   :  { %v1705_v34 = vsel %vm1693_vm4, %v2103_v18, 0.0  ;;  %v2124_v35 = vpop.f32.mrb[17].mxu1 }
 0x224   :  { %v1706_v38 = vadd.f32 %v1705_v34, %v1704_v1  ;;  %v2125_v39 = vadd.f32 %v2124_v35, %v2123_v30  ;;  %v2126_v40 = vpop.f32.mrb[18].mxu1 }
 0x225   :  { %v2127_v41 = vpop.f32.mrb[19].mxu1 }
 0x226   :  { %v1707_v42 = vsel %vm1693_vm4, %v2125_v39, 0.0 }
 0x227   :  { %v1708_v44 = vadd.f32 %v1707_v42, %v1706_v38 }
 0x229   :  { %v1716_v45 = vadd.f32 %v1948_v43, %v1708_v44 }
 0x22b   :  { %v1717_v49 = vpack.c.bf16 %v1716_v45, %v1716_v45 }
 0x22d   :  { %2137 = vmatmul.mubr.msk.bf16.vlgmr.msra.gmra.mrb[20].mxu0 %vm1741_vm5, %v1717_v49 }
 0x300   :  { %v1779_v51 = vpop.f32.mrb[20].mxu0 }
 0x301   :  { %v1780_v52 = vadd.f32 %v1949_v50, %v1779_v51  ;;  %v2138_v53 = vpop.f32.mrb[21].mxu0 }
 0x302   :  { %v1782_v54 = vpop.f32.mrb[22].mxu0 }
 0x303   :  { %v1786_v55 = vmul.f32 0.5, %v1780_v52  ;;  %v2139_v46 = vpop.f32.mrb[23].mxu0  ;;  %v1785_v15 = vadd.f32 1.0, %v1780_v52 }
 0x305   :  { %v1787_v16 = vmul.f32 %v1786_v55, %v1780_v52 }
 0x307   :  { %v1788_v19 = vadd.f32 %v1787_v16, %v1785_v15 }
 0x309   :  { %v1790_v24 = vsel %vm1789_vm6, %v1788_v19, 0.0 }
 0x30a   :  { %1791 = vadd.xlane.f32.xlu0 %v1790_v24 }
 0x397   :  { %v1792_v36 = vpop.xlane.xlu0 %1791 }
 0x398   :  { %2290 = vrcp.f32 %v1792_v36 }
 0x3a2   :  { %v2291_v37 = vpop.eup %2290 }
 0x3a3   :  { %v1794_v47 = vmul.f32 %v2291_v37, %v1788_v19 }
 0x3a5   :  { %1795 = vst.msk [vmem:[#allocation2] sm:$0x3] %vm1789_vm6, %v1794_v47 }
 0x3a6   :  { %2303 = shalt.err (!%p2300_p4)
}
 0x3a7   :  { %s2304_s24 = scalar_lea.hbm %s2905_s7, 32 }
 0x3a8   :  { %p2305_p5 = scmp.ne.s32.totalorder %s2905_s7, %s2304_s24  ;;  %p2308_p6 = scmp.lt.u32.totalorder %s2304_s24, %s2905_s7 }
 0x3aa   :  { %p2310_p7 = pnand %p2308_p6, %p2305_p5 }
 0x3ac   :  { %2313 = shalt.err (!%p2310_p7)
}
 0x3ad   :  { %1805 = dma.vmem_to_hbm [thread:$0]  %s1803_s0, 32, %s2905_s7, [#allocation3]  }
 0x3ae   :  { %2314 = dma.done.wait [#allocation3], 32  }
 0x3af   :  { %2315 = vsyncadd [#allocation3], 4294967264 }
 0x3b0   :  { %1809 = vsyncpa [#allocation3], 1 }

</bundles_post_ra>
